<compile_context>
chip_gen: v7x
topology: tpu7x:2x2x1
jax: 0.10.0
libtpu: 0.0.40
codegen_flags: <defaults>
</compile_context>

<pallas_src>
import functools

import jax
import jax.numpy as jnp
from jax.experimental import pallas as pl
from jax.experimental.pallas import tpu as pltpu

LANE = 128
SUB = 8


def _ru(x, m):
    return ((x + m - 1) // m) * m


# ----------------------------------------------------------------------------- fused conv matmul kernel
def _fused_mm_kernel(a_ref, b_ref, ps_ref, ph_ref, qs_ref, qh_ref, o_ref, *, pre, post):
    a = a_ref[...]
    if pre:   # folded BN + ReLU on the input patches (per-column scale/shift)
        a = jnp.maximum(a * ps_ref[...] + ph_ref[...], 0.0)
    out = jnp.dot(a.astype(jnp.bfloat16), b_ref[...],
                  preferred_element_type=jnp.float32)
    if post:  # folded BN + ReLU on the conv output
        out = jnp.maximum(out * qs_ref[...] + qh_ref[...], 0.0)
    o_ref[...] = out


@functools.partial(jax.jit, static_argnames=("pre", "post"))
def _fused_matmul(a, b, ps, ph, qs, qh, *, pre, post):
    # a: (Mp, Kp) f32, Mp % 8 == 0, Kp % 128 == 0
    # b: (Kp, Np) bf16, Np % 128 == 0 (lane-dense output stores)
    Mp, Kp = a.shape
    Np = b.shape[1]
    TM = 128 if Mp % 128 == 0 else Mp
    kern = functools.partial(_fused_mm_kernel, pre=pre, post=post)
    return pl.pallas_call(
        kern,
        out_shape=jax.ShapeDtypeStruct((Mp, Np), jnp.float32),
        grid=(Mp // TM,),
        in_specs=[
            pl.BlockSpec((TM, Kp), lambda i: (i, 0)),
            pl.BlockSpec((Kp, Np), lambda i: (0, 0)),
            pl.BlockSpec((1, Kp), lambda i: (0, 0)),
            pl.BlockSpec((1, Kp), lambda i: (0, 0)),
            pl.BlockSpec((1, Np), lambda i: (0, 0)),
            pl.BlockSpec((1, Np), lambda i: (0, 0)),
        ],
        out_specs=pl.BlockSpec((TM, Np), lambda i: (i, 0)),
        compiler_params=pltpu.CompilerParams(dimension_semantics=("parallel",)),
    )(a, b, ps, ph, qs, qh)


def conv_fused(a, wk, pre=None, post=None):
    """a: (M, K) f32 patch matrix. wk: packed conv dict (padded bf16 weights).
    pre/post: optional (scale, shift) pairs (already padded) for folded BN+ReLU."""
    M, K = a.shape
    Kp, Np = wk["w"].shape
    Mp = _ru(M, SUB)
    if Mp != M or Kp != K:
        a = jnp.pad(a, ((0, Mp - M), (0, Kp - K)))
    ps, ph = pre if pre is not None else (wk["zk"], wk["zk"])
    qs, qh = post if post is not None else (wk["zn"], wk["zn"])
    out = _fused_matmul(a, wk["w"], ps, ph, qs, qh,
                        pre=pre is not None, post=post is not None)
    return out[:M, :wk["cout"]]


# ----------------------------------------------------------------------------- head kernel (norm5+ReLU + GAP + Linear)
def _head_kernel(x_ref, s_ref, h_ref, w_ref, b_ref, o_ref, *, inv_hw):
    x = jnp.maximum(x_ref[...] * s_ref[...] + h_ref[...], 0.0)       # (Bp, HW, C)
    pooled = jnp.sum(x, axis=1) * inv_hw                             # (Bp, C)
    o_ref[...] = jnp.dot(pooled.astype(jnp.bfloat16), w_ref[...],
                         preferred_element_type=jnp.float32) + b_ref[...]


@jax.jit
def _head_call(x3, s, h, w, bias):
    Bp, HW, _ = x3.shape
    Np = w.shape[1]
    kern = functools.partial(_head_kernel, inv_hw=1.0 / HW)
    return pl.pallas_call(
        kern, out_shape=jax.ShapeDtypeStruct((Bp, Np), jnp.float32)
    )(x3, s, h, w, bias)


# ----------------------------------------------------------------------------- pooling reduction kernel
def _pool_max_kernel(p_ref, o_ref):
    o_ref[...] = jnp.max(p_ref[...], axis=0)


def _pool_avg_kernel(p_ref, o_ref, *, inv):
    o_ref[...] = jnp.sum(p_ref[...], axis=0) * inv


@functools.partial(jax.jit, static_argnames=("op",))
def pallas_pool(patches, op):
    # patches: (P, M, C) -> (M, C), reduced over the window axis P
    patches = patches.astype(jnp.float32)
    P, M, C = patches.shape
    kern = _pool_max_kernel if op == "max" else functools.partial(
        _pool_avg_kernel, inv=1.0 / P)
    if M > 128 and M % 128 == 0:       # row-tile for bigger inputs
        TM = 128
        return pl.pallas_call(
            kern,
            out_shape=jax.ShapeDtypeStruct((M, C), jnp.float32),
            grid=(M // TM,),
            in_specs=[pl.BlockSpec((P, TM, C), lambda i: (0, i, 0))],
            out_specs=pl.BlockSpec((TM, C), lambda i: (i, 0)),
            compiler_params=pltpu.CompilerParams(dimension_semantics=("parallel",)),
        )(patches)
    return pl.pallas_call(
        kern, out_shape=jax.ShapeDtypeStruct((M, C), jnp.float32))(patches)


# ----------------------------------------------------------------------------- NN glue (im2col / pooling windows)
def _im2col(x, kh, kw, stride, padding):
    B, H, W, C = x.shape
    OH = (H + 2 * padding - kh) // stride + 1
    OW = (W + 2 * padding - kw) // stride + 1
    if padding:
        x = jnp.pad(x, ((0, 0), (padding, padding), (padding, padding), (0, 0)))
    cols = []
    for di in range(kh):
        for dj in range(kw):
            cols.append(x[:, di:di + (OH - 1) * stride + 1:stride,
                             dj:dj + (OW - 1) * stride + 1:stride, :])
    patches = jnp.concatenate(cols, axis=-1).reshape(B * OH * OW, kh * kw * C)
    return patches, OH, OW


def maxpool2d_nhwc(x, k=3, stride=2, padding=1):
    B, H, W, C = x.shape
    OH = (H + 2 * padding - k) // stride + 1
    OW = (W + 2 * padding - k) // stride + 1
    xp = jnp.pad(x, ((0, 0), (padding, padding), (padding, padding), (0, 0)),
                 constant_values=-jnp.inf)
    pats = []
    for di in range(k):
        for dj in range(k):
            pats.append(
                xp[:, di:di + (OH - 1) * stride + 1:stride,
                      dj:dj + (OW - 1) * stride + 1:stride, :].reshape(B * OH * OW, C))
    return pallas_pool(jnp.stack(pats, axis=0), op="max").reshape(B, OH, OW, C)


def avgpool2d_nhwc(x, k=2, stride=2):
    B, H, W, C = x.shape
    OH = (H - k) // stride + 1
    OW = (W - k) // stride + 1
    pats = []
    for di in range(k):
        for dj in range(k):
            pats.append(
                x[:, di:di + (OH - 1) * stride + 1:stride,
                     dj:dj + (OW - 1) * stride + 1:stride, :].reshape(B * OH * OW, C))
    return pallas_pool(jnp.stack(pats, axis=0), op="avg").reshape(B, OH, OW, C)


# ----------------------------------------------------------------------------- parameter init (synthetic)
def _bn_params(key, c):
    k1, k2, k3, k4 = jax.random.split(key, 4)
    return dict(
        gamma=1.0 + 0.05 * jax.random.normal(k1, (c,), jnp.float32),
        beta=0.05 * jax.random.normal(k2, (c,), jnp.float32),
        mean=0.05 * jax.random.normal(k3, (c,), jnp.float32),
        var=1.0 + 0.05 * jnp.abs(jax.random.normal(k4, (c,), jnp.float32)),
    )


def _conv_w(key, out_c, in_c, kh, kw):
    fan_in = in_c * kh * kw
    std = (2.0 / fan_in) ** 0.5
    return std * jax.random.normal(key, (out_c, in_c, kh, kw), jnp.float32)


def init_densenet121_params(seed=0, num_classes=3):
    base = jax.random.PRNGKey(seed)
    counter = [0]

    def nk():
        counter[0] += 1
        return jax.random.fold_in(base, counter[0])

    growth, bn_size, init_feat = 32, 4, 64
    block_cfg = (6, 12, 24, 16)  # densenet121

    params = {
        "conv0_w": _conv_w(nk(), init_feat, 1, 7, 7),  # modified: 1 input channel
        "norm0": _bn_params(nk(), init_feat),
    }
    c = init_feat
    blocks, transitions = [], []
    for bi, nlayers in enumerate(block_cfg):
        layers = []
        for _ in range(nlayers):
            layers.append(dict(
                norm1=_bn_params(nk(), c),
                conv1_w=_conv_w(nk(), bn_size * growth, c, 1, 1),
                norm2=_bn_params(nk(), bn_size * growth),
                conv2_w=_conv_w(nk(), growth, bn_size * growth, 3, 3),
            ))
            c += growth
        blocks.append(layers)
        if bi < 3:
            transitions.append(dict(
                norm=_bn_params(nk(), c),
                conv_w=_conv_w(nk(), c // 2, c, 1, 1),
            ))
            c //= 2
    params["blocks"] = blocks
    params["transitions"] = transitions
    params["norm5"] = _bn_params(nk(), c)  # c == 1024
    params["fc_w"] = (1.0 / (c ** 0.5)) * jax.random.normal(nk(), (num_classes, c), jnp.float32)
    params["fc_b"] = jnp.zeros((num_classes,), jnp.float32)
    return params


# ----------------------------------------------------------------------------- one-time packing into kernel layout
def _fold_bn(p, eps=1e-5):
    scale = p["gamma"] / jnp.sqrt(p["var"] + eps)
    shift = p["beta"] - p["mean"] * scale
    return scale.astype(jnp.float32), shift.astype(jnp.float32)


def _pack_conv(w):
    cout, cin, kh, kw = w.shape
    K = kh * kw * cin
    Kp, Np = _ru(K, LANE), _ru(cout, LANE)
    wmat = jnp.transpose(w, (2, 3, 1, 0)).reshape(K, cout)
    wmat = jnp.pad(wmat, ((0, Kp - K), (0, Np - cout))).astype(jnp.bfloat16)
    return {"w": wmat, "cout": cout,
            "zk": jnp.zeros((1, Kp), jnp.float32),
            "zn": jnp.zeros((1, Np), jnp.float32)}


def _pack_vec(v, Kp):
    return jnp.pad(v, (0, Kp - v.shape[0])).reshape(1, Kp)


def prepare_kernel_params(params):
    kp = {"conv0": _pack_conv(params["conv0_w"])}
    s0, h0 = _fold_bn(params["norm0"])
    Np0 = kp["conv0"]["w"].shape[1]
    kp["norm0_post"] = (_pack_vec(s0, Np0), _pack_vec(h0, Np0))

    blocks = []
    for bi in range(4):
        layers = []
        for layer in params["blocks"][bi]:
            conv1 = _pack_conv(layer["conv1_w"])   # 1x1 bottleneck
            conv2 = _pack_conv(layer["conv2_w"])   # 3x3 growth
            Kp1, Np1 = conv1["w"].shape
            s1, h1 = _fold_bn(layer["norm1"])
            s2, h2 = _fold_bn(layer["norm2"])
            layers.append({
                "conv1": conv1, "conv2": conv2,
                "pre1": (_pack_vec(s1, Kp1), _pack_vec(h1, Kp1)),
                "post2": (_pack_vec(s2, Np1), _pack_vec(h2, Np1)),
            })
        blocks.append(layers)
    kp["blocks"] = blocks

    trans = []
    for t in params["transitions"]:
        conv = _pack_conv(t["conv_w"])
        Kp = conv["w"].shape[0]
        s, h = _fold_bn(t["norm"])
        trans.append({"conv": conv, "pre": (_pack_vec(s, Kp), _pack_vec(h, Kp))})
    kp["transitions"] = trans

    s5, h5 = _fold_bn(params["norm5"])
    C = s5.shape[0]
    kp["norm5_s"] = s5.reshape(1, 1, C)
    kp["norm5_h"] = h5.reshape(1, 1, C)
    nc = params["fc_w"].shape[0]
    Nf = _ru(nc, LANE)
    kp["fc_w"] = jnp.pad(params["fc_w"].T, ((0, 0), (0, Nf - nc))).astype(jnp.bfloat16)
    kp["fc_b"] = jnp.pad(params["fc_b"], (0, Nf - nc)).reshape(1, Nf)
    kp["num_classes"] = nc
    return kp


# ----------------------------------------------------------------------------- forward (MLModel.forward)
def mlmodel_forward(kp, x_nchw):
    # layout: input is NCHW like PyTorch; compute is NHWC internally.
    x = jnp.transpose(x_nchw.astype(jnp.float32), (0, 2, 3, 1))
    B = x.shape[0]

    # stem: conv0 (7x7 s2 p3) with norm0+ReLU fused as epilogue, then maxpool
    patches, OH, OW = _im2col(x, 7, 7, 2, 3)
    x = conv_fused(patches, kp["conv0"], post=kp["norm0_post"]).reshape(B, OH, OW, -1)
    x = maxpool2d_nhwc(x, k=3, stride=2, padding=1)

    # dense blocks + transitions
    for bi in range(4):
        for L in kp["blocks"][bi]:
            Bc, H, W, C = x.shape
            # norm1+ReLU -> 1x1 conv -> norm2+ReLU : ONE fused matmul call
            y = conv_fused(x.reshape(Bc * H * W, C), L["conv1"],
                           pre=L["pre1"], post=L["post2"]).reshape(Bc, H, W, -1)
            # 3x3 growth conv on the already-activated bottleneck
            patches, OH, OW = _im2col(y, 3, 3, 1, 1)
            y = conv_fused(patches, L["conv2"]).reshape(Bc, OH, OW, -1)
            x = jnp.concatenate([x, y], axis=-1)
        if bi < 3:
            T = kp["transitions"][bi]
            Bc, H, W, C = x.shape
            x = conv_fused(x.reshape(Bc * H * W, C), T["conv"],
                           pre=T["pre"]).reshape(Bc, H, W, -1)
            x = avgpool2d_nhwc(x, k=2, stride=2)

    # head: norm5+ReLU -> global avg pool -> [Dropout=id] -> Linear (one kernel)
    Bc, H, W, C = x.shape
    x3 = x.reshape(Bc, H * W, C)
    Bp = _ru(Bc, SUB)
    if Bp != Bc:
        x3 = jnp.pad(x3, ((0, Bp - Bc), (0, 0), (0, 0)))
    logits = _head_call(x3, kp["norm5_s"], kp["norm5_h"], kp["fc_w"], kp["fc_b"])
    return logits[:Bc, :kp["num_classes"]]


# ----------------------------------------------------------------------------- main
if __name__ == "__main__":
    params = init_densenet121_params(seed=0, num_classes=3)
    kparams = prepare_kernel_params(params)

    key = jax.random.PRNGKey(0)
    # small grayscale batch consistent with the modified conv0 (1 input channel), NCHW
    x = jax.random.normal(key, (2, 1, 32, 32), jnp.float32)

    out = mlmodel_forward(kparams, x)
    out = jax.block_until_ready(out)

    assert out.shape == (2, 3), out.shape
    assert bool(jnp.all(jnp.isfinite(out)))
    print("KERNEL_OK")
</pallas_src>

<mosaic_0001>
module attributes {stable_mosaic.version = 11 : i64} {
  func.func @_fused_mm_kernel(%arg0: i32, %arg1: memref<128x128xf32, #tpu.memory_space<vmem>>, %arg2: memref<128x128xbf16, #tpu.memory_space<vmem>>, %arg3: memref<1x128xf32, #tpu.memory_space<vmem>>, %arg4: memref<1x128xf32, #tpu.memory_space<vmem>>, %arg5: memref<1x128xf32, #tpu.memory_space<vmem>>, %arg6: memref<1x128xf32, #tpu.memory_space<vmem>>, %arg7: memref<128x128xf32, #tpu.memory_space<vmem>>) attributes {dimension_semantics = [#tpu.dimension_semantics<parallel>], iteration_bounds = array<i64: 4>, scalar_prefetch = 0 : i64, scratch_operands = 0 : i64, tpu.core_type = #tpu.core_type<tc>, window_params = [{transform_indices = @transform_0, window_bounds = array<i64: 128, 128>}, {pipeline_mode = #tpu.pipeline_mode<synchronous>, transform_indices = @transform_1, window_bounds = array<i64: 128, 128>}, {pipeline_mode = #tpu.pipeline_mode<synchronous>, transform_indices = @transform_2, window_bounds = array<i64: 1, 128>}, {pipeline_mode = #tpu.pipeline_mode<synchronous>, transform_indices = @transform_3, window_bounds = array<i64: 1, 128>}, {pipeline_mode = #tpu.pipeline_mode<synchronous>, transform_indices = @transform_4, window_bounds = array<i64: 1, 128>}, {pipeline_mode = #tpu.pipeline_mode<synchronous>, transform_indices = @transform_5, window_bounds = array<i64: 1, 128>}, {transform_indices = @transform_6, window_bounds = array<i64: 128, 128>}]} {
    %c0 = arith.constant 0 : index
    %c0_0 = arith.constant 0 : index
    %0 = vector.load %arg1[%c0, %c0_0] : memref<128x128xf32, #tpu.memory_space<vmem>>, vector<128x128xf32>
    %1 = arith.truncf %0 : vector<128x128xf32> to vector<128x128xbf16>
    %c0_1 = arith.constant 0 : index
    %c0_2 = arith.constant 0 : index
    %2 = vector.load %arg2[%c0_1, %c0_2] : memref<128x128xbf16, #tpu.memory_space<vmem>>, vector<128x128xbf16>
    %cst = arith.constant dense<0.000000e+00> : vector<128x128xf32>
    %3 = tpu.matmul %1, %2, %cst {dimension_numbers = #tpu.dot_dimension_numbers<[1], [0], [0], [1], [0, 0, 1, 1], [], []>} : vector<128x128xbf16>, vector<128x128xbf16>, vector<128x128xf32> -> vector<128x128xf32>
    %c0_3 = arith.constant 0 : index
    %c0_4 = arith.constant 0 : index
    %4 = vector.load %arg5[%c0_3, %c0_4] : memref<1x128xf32, #tpu.memory_space<vmem>>, vector<1x128xf32>
    %5 = vector.broadcast %4 : vector<1x128xf32> to vector<128x128xf32>
    %6 = arith.mulf %3, %5 : vector<128x128xf32>
    %c0_5 = arith.constant 0 : index
    %c0_6 = arith.constant 0 : index
    %7 = vector.load %arg6[%c0_5, %c0_6] : memref<1x128xf32, #tpu.memory_space<vmem>>, vector<1x128xf32>
    %8 = vector.broadcast %7 : vector<1x128xf32> to vector<128x128xf32>
    %9 = arith.addf %6, %8 : vector<128x128xf32>
    %cst_7 = arith.constant 0.000000e+00 : f32
    %10 = vector.broadcast %cst_7 : f32 to vector<128x128xf32>
    %11 = arith.maximumf %9, %10 : vector<128x128xf32>
    %c0_8 = arith.constant 0 : index
    %c0_9 = arith.constant 0 : index
    %12 = vector.load %arg7[%c0_8, %c0_9] : memref<128x128xf32, #tpu.memory_space<vmem>>, vector<128x128xf32>
    tpu.vector_store %arg7[%c0_8, %c0_9], %11 {strides = array<i32>} : memref<128x128xf32, #tpu.memory_space<vmem>>, vector<128x128xf32>,
    return
  }
  func.func @transform_0(%arg0: i32) -> (i32, i32) {
    %c0_i32 = arith.constant 0 : i32
    %c0_i32_0 = arith.constant 0 : i32
    return %arg0, %c0_i32 : i32, i32
  }
  func.func @transform_1(%arg0: i32) -> (i32, i32) {
    %c0_i32 = arith.constant 0 : i32
    %c0_i32_0 = arith.constant 0 : i32
    %c0_i32_1 = arith.constant 0 : i32
    return %c0_i32, %c0_i32_0 : i32, i32
  }
  func.func @transform_2(%arg0: i32) -> (i32, i32) {
    %c0_i32 = arith.constant 0 : i32
    %c0_i32_0 = arith.constant 0 : i32
    %c0_i32_1 = arith.constant 0 : i32
    return %c0_i32, %c0_i32_0 : i32, i32
  }
  func.func @transform_3(%arg0: i32) -> (i32, i32) {
    %c0_i32 = arith.constant 0 : i32
    %c0_i32_0 = arith.constant 0 : i32
    %c0_i32_1 = arith.constant 0 : i32
    return %c0_i32, %c0_i32_0 : i32, i32
  }
  func.func @transform_4(%arg0: i32) -> (i32, i32) {
    %c0_i32 = arith.constant 0 : i32
    %c0_i32_0 = arith.constant 0 : i32
    %c0_i32_1 = arith.constant 0 : i32
    return %c0_i32, %c0_i32_0 : i32, i32
  }
  func.func @transform_5(%arg0: i32) -> (i32, i32) {
    %c0_i32 = arith.constant 0 : i32
    %c0_i32_0 = arith.constant 0 : i32
    %c0_i32_1 = arith.constant 0 : i32
    return %c0_i32, %c0_i32_0 : i32, i32
  }
  func.func @transform_6(%arg0: i32) -> (i32, i32) {
    %c0_i32 = arith.constant 0 : i32
    %c0_i32_0 = arith.constant 0 : i32
    return %arg0, %c0_i32 : i32, i32
  }
}

</mosaic_0001>

<bundles_post_ra>
// kernel: _fused_matmul.1
= control target key start
LH: loop header
LB: loop body
LE: loop exit
PB: predicated region body
PF: predicated region fallthrough
CT: control target
= control target key end

     0   :  { %11 = vsyncpa [#allocation3], 0  ;;  %s1242_s0 = inlined_call_operand.hbm [shape: f32[512,128], index: 0, kind: input, shape index: {}]   ;;  %s1243_s1 = inlined_call_operand.hbm [shape: bf16[128,128], index: 1, kind: input, shape index: {}]   ;;  %s1244_s2 = inlined_call_operand.vmem [shape: f32[1,128], index: 2, kind: input, shape index: {}]   ;;  %s1245_s3 = inlined_call_operand.vmem [shape: f32[1,128], index: 3, kind: input, shape index: {}]   ;;  %s1246_s4 = inlined_call_operand.vmem [shape: f32[1,128], index: 4, kind: input, shape index: {}]   ;;  %s1247_s5 = inlined_call_operand.vmem [shape: f32[1,128], index: 5, kind: input, shape index: {}]   ;;  %s1248_s6 = inlined_call_operand.hbm [shape: f32[512,128], index: 6, kind: output, shape index: {}]  }
   0x1   :  { %13 = vsyncpa [#allocation3 + $0x1], 0 }
   0x2   :  { %14 = vsyncpa [#allocation6], 0 }
   0x3   :  { %15 = vsyncpa [#allocation4], 0 }
   0x4   :  { %17 = vsyncpa [#allocation4 + $0x1], 0  ;;  %s985_s21 = smov 0   ;;  %s987_s2 = smov 0  }
   0x5   :  { %s989_s22 = smov 0   ;;  %s991_s3 = smov 0  }
   0x6 LB: > { %s1006_s23 = sadd.s32 4294967295, %s939_s3   ;;  %s648_s24 = sadd.s32 4294967294, %s939_s3   ;;  %s939_s3 = sphi %s991_s3, %s1267_s3   ;;  %s935_s22 = sphi %s989_s22, %s1266_s22   ;;  %s931_s2 = sphi %s987_s2, %s1265_s2   ;;  %s927_s21 = sphi %s985_s21, %s1264_s21  }
   0x7   : > { %p43_p0 = scmp.ne.s32.totalorder %s931_s2, %s927_s21  ;;  %p1249_p1 = scmp.eq.s32.totalorder %s1006_s23, 0 }
   0x8   : > { %p178_p3 = scmp.eq.s32.totalorder %s648_s24, 3  ;;  %p649_p5 = scmp.ge.s32.totalorder %s939_s3, 1 }
   0x9   : > { %p1015_p4 = por %p1249_p1, %p43_p0  ;;  %p185_p7 = scmp.lt.s32.totalorder %s939_s3, 5 }
   0xa   : > { %p1020_p6 = por %p178_p3, %p43_p0  ;;  %s941_s28 = smov [#allocation5]  }
   0xb   : > { %s1252_s25 = scalar_select %p1015_p4, 1, 0 }
   0xc   : > { %s1253_s26 = scalar_select %p1020_p6, 1, 0 }
   0xd   : > { %p1025_p8 = pnand %p649_p5, %p185_p7  ;;  %s197_s29 = sshll.u32 %s941_s28, 4  ;;  %s198_s29 = int_to_ptr.vmem [resolvable:$true] %s197_s29 }
   0xe   : > { %s1038_s7 = sadd.s32 1, %s939_s3   ;;  %s30_s8 = sadd.s32 1, %s935_s22 }
   0xf   : > { %s1254_s27 = scalar_select %p1025_p8, 1, 0 }
  0x10   : > { %p748_p9 = pneg %p1025_p8  ;;  %s27_s9 = ssub.s32 %s939_s3, %s1038_s7 }
  0x11   : > { %s811_s12 = scalar_lea.hbm %s1243_s1, 1024 }
  0x12   : > { %p1033_p10 = pnand %p748_p9, %p1249_p1  ;;  %p812_p11 = scmp.ne.s32.totalorder %s1243_s1, %s811_s12 }
  0x13   : > { %p818_p3 = scmp.lt.u32.totalorder %s811_s12, %s1243_s1 }
  0x14   : > { %p813_p12 = pneg %p1033_p10 }
  0x16   : > { %p814_p13 = pnand %p813_p12, %p812_p11 }
  0x18   : > { %p815_p0 = pneg %p814_p13 }
  0x1a   : > { %p820_p5 = pnand %p818_p3, %p815_p0 }
  0x1c   : > { %823 = shalt.err (!%p820_p5)
}
  0x1d   : > { %s824_s17 = scalar_lea.vmem %s198_s29, 1024  ;;  %p832_p2 = scmp.lt.s32.totalorder %s198_s29, %s198_s29 }
  0x1e   : > { %p825_p7 = scmp.ne.s32.totalorder %s198_s29, %s824_s17  ;;  %p833_p6 = scmp.lt.s32.totalorder %s824_s17, %s824_s17 }
  0x20   : > { %p827_p9 = pnand %p825_p7, %p813_p12  ;;  %p834_p4 = por %p833_p6, %p832_p2 }
  0x22   : > { %p828_p1 = pneg %p827_p9 }
  0x24   : > { %p835_p8 = pnand %p834_p4, %p828_p1 }
  0x26   : > { %838 = shalt.err (!%p835_p8)
}
  0x27   : > { %s942_s18 = smov 64   ;;  %s943_s19 = smov 4  }
  0x28   : > { %751 = dma.hbm_to_vmem [thread:$0]  (!%p1033_p10), %s1243_s1, 1024, %s198_s29, [#allocation6], %s942_s18, %s942_s18, %s943_s19  }
  0x29   : > { %p28_p11 = scmp.eq.s32.totalorder %s27_s9, 0  ;;  %p37_p2 = scmp.ne.s32.totalorder %s935_s22, %s931_s2 }
  0x2a   : > { %p38_p1 = scmp.eq.s32.totalorder %s939_s3, 0  ;;  %p761_p4 = scmp.lt.s32.totalorder %s939_s3, 4 }
  0x2b   : > { %s1064_s28 = scalar_select %p28_p11, %s935_s22, %s30_s8  }
  0x2c   : > { %p39_p6 = por %p38_p1, %p37_p2  ;;  %p1256_p8 = scmp.eq.s32.totalorder %s1006_s23, 3 }
  0x2d   : > { %s223_s11 = sand.u32 1, %s935_s22   ;;  %s674_s12 = sshll.u32 %s939_s3, 11 }
  0x2e   : > { %p1068_p12 = por %p1256_p8, %p37_p2  ;;  %s652_s13 = sshll.u32 %s223_s11, 7 }
  0x2f   : > { %s1077_s15 = scalar_lea.hbm %s1242_s0, %s674_s12  ;;  %s227_s29 = scalar_lea.vmem [#allocation2], %s652_s13 }
  0x30   : > { %s234_s8 = sshll.u32 %s227_s29, 4  ;;  %p1079_p10 = pnand %p761_p4, %p39_p6  ;;  %s1083_s8 = int_to_ptr.vmem [resolvable:$true] %s234_s8 }
  0x31   : > { %s1085_s16 = scalar_lea.sflag [#allocation3], %s223_s11  ;;  %s839_s17 = scalar_lea.hbm %s1077_s15, 2048 }
  0x32   : > { %p840_p13 = scmp.ne.s32.totalorder %s1077_s15, %s839_s17  ;;  %p841_p0 = pneg %p1079_p10 }
  0x33   : > { %s844_s20 = scalar_lea.hbm %s1242_s0, 8192  ;;  %p845_p7 = scmp.lt.u32.totalorder %s1077_s15, %s1242_s0 }
  0x34   : > { %p842_p3 = pnand %p841_p0, %p840_p13  ;;  %p846_p9 = scmp.lt.u32.totalorder %s844_s20, %s839_s17 }
  0x35   : > { %p848_p2 = scmp.lt.u32.totalorder %s839_s17, %s1077_s15 }
  0x36   : > { %p843_p5 = pneg %p842_p3  ;;  %p847_p11 = por %p846_p9, %p845_p7 }
  0x38   : > { %p849_p1 = por %p848_p2, %p847_p11 }
  0x3a   : > { %p850_p4 = pnand %p849_p1, %p843_p5 }
  0x3c   : > { %853 = shalt.err (!%p850_p4)
}
  0x3d   : > { %s854_s11 = scalar_lea.vmem %s1083_s8, 2048  ;;  %s944_s13 = smov [#allocation2]  }
  0x3e   : > { %p855_p6 = scmp.ne.s32.totalorder %s1083_s8, %s854_s11  ;;  %s859_s30 = sshll.u32 %s944_s13, 4  ;;  %s860_s30 = int_to_ptr.vmem [resolvable:$false] %s859_s30 }
  0x3f   : > { %s861_s14 = scalar_lea.vmem %s860_s30, 4096  ;;  %p862_p3 = scmp.lt.s32.totalorder %s1083_s8, %s860_s30 }
  0x40   : > { %p857_p8 = pnand %p855_p6, %p841_p0  ;;  %p863_p7 = scmp.lt.s32.totalorder %s861_s14, %s854_s11 }
  0x42   : > { %p858_p13 = pneg %p857_p8  ;;  %p864_p9 = por %p863_p7, %p862_p3 }
  0x44   : > { %p865_p11 = pnand %p864_p9, %p858_p13 }
  0x46   : > { %868 = shalt.err (!%p865_p11)
}
  0x47   : > { %s945_s29 = smov 128   ;;  %s946_s17 = smov 8  }
  0x48   : > { %755 = dma.hbm_to_vmem [thread:$0]  (!%p1079_p10), %s1077_s15, 2048, %s1083_s8, %s1085_s16, %s945_s29, %s945_s29, %s946_s17  }
  0x49   : > { %p1259_p0 = scmp.ne.s32.totalorder %s1254_s27, 0 }
  0x4a   : > { %s1116_s18 = sand.u32 (!%p1259_p0), 1, %s931_s2   ;;  %p1260_p5 = scmp.ne.s32.totalorder (!%p1259_p0), %s1252_s25, 0 }
  0x4b   : > { %246 = sbr.rel (%p1259_p0) target bundleno = 363 (0x16b), region = 44  ;;  %s656_s19 = sshll.u32 (!%p1259_p0), %s1116_s18, 7 }
  0x4c   : > { %s249_s20 = scalar_lea.sflag (!%p1259_p0), [#allocation3], %s1116_s18  ;;  %s1122_s24 = scalar_lea.vmem (!%p1259_p0), [#allocation2], %s656_s19 }
  0x52   : > { %914 = dma.done.wait (%p1260_p5), %s249_s20, 2048  }
  0x53   : > { %916 = vsyncadd (%p1260_p5), %s249_s20, 4294965248  ;;  %p1261_p10 = scmp.eq.s32.totalorder %s1006_s23, 0 }
  0x55   : > { %918 = dma.done.wait (%p1261_p10), [#allocation6], 1024   ;;  %p1262_p2 = pmov %p1261_p10 }
  0x56   : > { %v803_v0 = vld [vmem:[#allocation5] sm:$0xff]   ;;  %v804_v1 = vld [vmem:[#allocation5 + $0x8] sm:$0xff]   ;;  %v805_v2 = vld [vmem:[#allocation5 + $0x10] sm:$0xff]   ;;  %s1166_s9 = scalar_lea.vmem [#allocation7], %s656_s19  ;;  %s675_s16 = sshll.u32 %s1006_s23, 11 }
  0x57   : > { %920 = vsyncadd (%p1262_p2), [#allocation6], 4294966272  ;;  %692 = vmatprep.subr.bf16.mxu0 %v803_v0  ;;  %724 = vmatprep.subr.bf16.mxu1 %v803_v0  ;;  %v806_v3 = vld [vmem:[#allocation5 + $0x18] sm:$0xff]   ;;  %v288_v4 = vld [vmem:[%s1122_s24] sm:$0xff]  ;;  %s565_s12 = sshll.u32 %s1166_s9, 4  ;;  %s1191_s13 = scalar_lea.hbm %s1248_s6, %s675_s16  ;;  %s1193_s12 = int_to_ptr.vmem [resolvable:$true] %s565_s12 }
  0x58   : > { %693 = vmatpush3.bf16.msra.mxu0 %v803_v0  ;;  %732 = vmatpush3.bf16.msra.mxu1 %v803_v0  ;;  %v289_v5 = vld [vmem:[%s1122_s24 + $0x8] sm:$0xff]  ;;  %v296_v6 = vld [vmem:[%s1122_s24 + $0x40] sm:$0xff]  ;;  %v809_v12 = vld [vmem:[#allocation5 + $0x30] sm:$0xff]   ;;  %s552_s30 = scalar_lea.sflag [#allocation4], %s1116_s18  ;;  %s869_s14 = scalar_lea.vmem %s1193_s12, 2048 }
  0x59   : > { %694 = vmatprep.subr.bf16.mxu0 %v804_v1  ;;  %725 = vmatprep.subr.bf16.mxu1 %v804_v1  ;;  %v304_v7 = vpack.c.bf16 %v289_v5, %v288_v4  ;;  %v297_v8 = vld [vmem:[%s1122_s24 + $0x48] sm:$0xff]  ;;  %v807_v10 = vld [vmem:[#allocation5 + $0x20] sm:$0xff]   ;;  %v810_v13 = vld [vmem:[#allocation5 + $0x38] sm:$0xff]   ;;  %p870_p1 = scmp.ne.s32.totalorder %s1193_s12, %s869_s14  ;;  %s947_s29 = smov [#allocation7]  }
  0x5a   : > { %v308_v9 = vpack.c.bf16 %v297_v8, %v296_v6  ;;  %v808_v11 = vld [vmem:[#allocation5 + $0x28] sm:$0xff]   ;;  %v290_v14 = vld [vmem:[%s1122_s24 + $0x10] sm:$0xff]  ;;  %v291_v15 = vld [vmem:[%s1122_s24 + $0x18] sm:$0xff]  ;;  %s873_s17 = sshll.u32 %s947_s29, 4  ;;  %s874_s17 = int_to_ptr.vmem [resolvable:$false] %s873_s17 }
  0x5b   : > { %708 = vmatprep.mubr.bf16.mxu0 %v304_v7  ;;  %v298_v16 = vld [vmem:[%s1122_s24 + $0x50] sm:$0xff]  ;;  %v299_v17 = vld [vmem:[%s1122_s24 + $0x58] sm:$0xff]  ;;  %v292_v18 = vld [vmem:[%s1122_s24 + $0x20] sm:$0xff]  ;;  %v305_v22 = vpack.c.bf16 %v291_v15, %v290_v14  ;;  %p871_p4 = pnand %p870_p1, %p1068_p12  ;;  %s875_s19 = scalar_lea.vmem %s874_s17, 4096 }
  0x5c   : > { %695 = vmatpush3.bf16.msra.mxu0 %v804_v1  ;;  %733 = vmatpush3.bf16.msra.mxu1 %v804_v1  ;;  %v293_v19 = vld [vmem:[%s1122_s24 + $0x28] sm:$0xff]  ;;  %v300_v20 = vld [vmem:[%s1122_s24 + $0x60] sm:$0xff]  ;;  %v309_v23 = vpack.c.bf16 %v299_v17, %v298_v16  ;;  %v294_v26 = vld [vmem:[%s1122_s24 + $0x30] sm:$0xff]  ;;  %p876_p8 = scmp.lt.s32.totalorder %s1193_s12, %s874_s17  ;;  %p877_p13 = scmp.lt.s32.totalorder %s875_s19, %s869_s14 }
  0x5d   : > { %696 = vmatprep.subr.bf16.mxu0 %v805_v2  ;;  %726 = vmatprep.subr.bf16.mxu1 %v805_v2  ;;  %v301_v21 = vld [vmem:[%s1122_s24 + $0x68] sm:$0xff]  ;;  %v306_v24 = vpack.c.bf16 %v293_v19, %v292_v18  ;;  %v295_v27 = vld [vmem:[%s1122_s24 + $0x38] sm:$0xff]  ;;  %v302_v28 = vld [vmem:[%s1122_s24 + $0x70] sm:$0xff]  ;;  %p872_p6 = pneg %p871_p4 }
  0x5e   : > { %716 = vmatprep.mubr.bf16.mxu1 %v308_v9  ;;  %v310_v25 = vpack.c.bf16 %v301_v21, %v300_v20  ;;  %v303_v29 = vld [vmem:[%s1122_s24 + $0x78] sm:$0xff]  ;;  %v307_v30 = vpack.c.bf16 %v295_v27, %v294_v26  ;;  %v667_v32 = vld [vmem:[%s1246_s4] ss:$0 sm:$0xff]  ;;  %p878_p3 = por %p877_p13, %p876_p8 }
  0x5f   : > { %v311_v31 = vpack.c.bf16 %v303_v29, %v302_v28  ;;  %v1154_v34 = vld [vmem:[%s1247_s5] ss:$0 sm:$0xff] }
  0x60   : > { %697 = vmatpush3.bf16.msra.mxu0 %v805_v2  ;;  %734 = vmatpush3.bf16.msra.mxu1 %v805_v2  ;;  %p879_p7 = pnand %p878_p3, %p872_p6 }
  0x61   : > { %698 = vmatprep.subr.bf16.mxu0 %v806_v3  ;;  %727 = vmatprep.subr.bf16.mxu1 %v806_v3 }
  0x64   : > { %699 = vmatpush3.bf16.msra.mxu0 %v806_v3  ;;  %735 = vmatpush3.bf16.msra.mxu1 %v806_v3 }
  0x65   : > { %700 = vmatprep.subr.bf16.mxu0 %v807_v10  ;;  %728 = vmatprep.subr.bf16.mxu1 %v807_v10 }
  0x68   : > { %701 = vmatpush3.bf16.msra.mxu0 %v807_v10  ;;  %736 = vmatpush3.bf16.msra.mxu1 %v807_v10 }
  0x69   : > { %702 = vmatprep.subr.bf16.mxu0 %v808_v11  ;;  %729 = vmatprep.subr.bf16.mxu1 %v808_v11 }
  0x6c   : > { %703 = vmatpush3.bf16.msra.mxu0 %v808_v11  ;;  %737 = vmatpush3.bf16.msra.mxu1 %v808_v11 }
  0x6d   : > { %704 = vmatprep.subr.bf16.mxu0 %v809_v12  ;;  %730 = vmatprep.subr.bf16.mxu1 %v809_v12 }
  0x70   : > { %705 = vmatpush3.bf16.msra.mxu0 %v809_v12  ;;  %738 = vmatpush3.bf16.msra.mxu1 %v809_v12 }
  0x71   : > { %706 = vmatprep.subr.bf16.mxu0 %v810_v13  ;;  %731 = vmatprep.subr.bf16.mxu1 %v810_v13 }
  0x74   : > { %707 = vmatpush3.bf16.msra.mxu0 %v810_v13  ;;  %739 = vmatpush3.bf16.msra.mxu1 %v810_v13 }
  0x77   : > { %709 = vmatmul.mubr.bf16.vlgmr.msra.gmra.mrb[0].mxu0 %v305_v22  ;;  %717 = vmatmul.mubr.bf16.vlgmr.msra.gmra.mrb[0].mxu1 %v309_v23 }
  0x78   : > { %712 = vmatprep.mubr.bf16.mxu0 %v306_v24  ;;  %720 = vmatprep.mubr.bf16.mxu1 %v310_v25 }
  0x7f   : > { %713 = vmatmul.mubr.bf16.gmra.mrb[4].mxu0 %v307_v30  ;;  %721 = vmatmul.mubr.bf16.gmra.mrb[4].mxu1 %v311_v31 }
 0x14a   : > { %v710_v33 = vpop.f32.mrb[0].mxu0  ;;  %v718_v35 = vpop.f32.mrb[0].mxu1 }
 0x14b   : > { %v482_v36 = vmul.f32 %v710_v33, %v667_v32  ;;  %v490_v37 = vmul.f32 %v718_v35, %v667_v32  ;;  %v410_v38 = vpop.f32.mrb[1].mxu0  ;;  %v442_v39 = vpop.f32.mrb[1].mxu1 }
 0x14c   : > { %v480_v40 = vmul.f32 %v667_v32, %v410_v38  ;;  %v488_v41 = vmul.f32 %v667_v32, %v442_v39  ;;  %v711_v42 = vpop.f32.mrb[2].mxu0  ;;  %v719_v43 = vpop.f32.mrb[2].mxu1 }
 0x14d   : > { %v505_v44 = vadd.f32 %v1154_v34, %v482_v36  ;;  %v513_v45 = vadd.f32 %v1154_v34, %v490_v37  ;;  %v483_v46 = vmul.f32 %v711_v42, %v667_v32  ;;  %v491_v47 = vmul.f32 %v719_v43, %v667_v32  ;;  %v413_v48 = vpop.f32.mrb[3].mxu0  ;;  %v445_v49 = vpop.f32.mrb[3].mxu1 }
 0x14e   : > { %v503_v50 = vadd.f32 %v1154_v34, %v480_v40  ;;  %v511_v51 = vadd.f32 %v1154_v34, %v488_v41  ;;  %v481_v52 = vmul.f32 %v667_v32, %v413_v48  ;;  %v489_v53 = vmul.f32 %v667_v32, %v445_v49 }
 0x14f   : > { %v521_v54 = vmax.f32 %v505_v44, 0.0  ;;  %v529_v55 = vmax.f32 %v513_v45, 0.0  ;;  %v506_v56 = vadd.f32 %v1154_v34, %v483_v46  ;;  %v514_v57 = vadd.f32 %v1154_v34, %v491_v47 }
 0x150   : > { %v519_v58 = vmax.f32 %v503_v50, 0.0  ;;  %v527_v59 = vmax.f32 %v511_v51, 0.0  ;;  %v504_v60 = vadd.f32 %v1154_v34, %v481_v52  ;;  %v512_v61 = vadd.f32 %v1154_v34, %v489_v53 }
 0x151   : > { %537 = vst [vmem:[%s1166_s9 + $0x10] sm:$0xff] %v521_v54  ;;  %545 = vst [vmem:[%s1166_s9 + $0x50] sm:$0xff] %v529_v55  ;;  %v522_v62 = vmax.f32 %v506_v56, 0.0  ;;  %v530_v63 = vmax.f32 %v514_v57, 0.0 }
 0x152   : > { %535 = vst [vmem:[%s1166_s9] sm:$0xff] %v519_v58  ;;  %543 = vst [vmem:[%s1166_s9 + $0x40] sm:$0xff] %v527_v59  ;;  %v520_v0 = vmax.f32 %v504_v60, 0.0  ;;  %v528_v1 = vmax.f32 %v512_v61, 0.0  ;;  %v714_v2 = vpop.f32.mrb[4].mxu0  ;;  %v722_v3 = vpop.f32.mrb[4].mxu1 }
 0x153   : > { %538 = vst [vmem:[%s1166_s9 + $0x18] sm:$0xff] %v522_v62  ;;  %546 = vst [vmem:[%s1166_s9 + $0x58] sm:$0xff] %v530_v63  ;;  %v486_v4 = vmul.f32 %v714_v2, %v667_v32  ;;  %v494_v5 = vmul.f32 %v722_v3, %v667_v32  ;;  %v426_v6 = vpop.f32.mrb[5].mxu0  ;;  %v458_v7 = vpop.f32.mrb[5].mxu1 }
 0x154   : > { %536 = vst [vmem:[%s1166_s9 + $0x8] sm:$0xff] %v520_v0  ;;  %544 = vst [vmem:[%s1166_s9 + $0x48] sm:$0xff] %v528_v1  ;;  %v484_v8 = vmul.f32 %v667_v32, %v426_v6  ;;  %v492_v9 = vmul.f32 %v667_v32, %v458_v7  ;;  %v715_v10 = vpop.f32.mrb[6].mxu0  ;;  %v723_v11 = vpop.f32.mrb[6].mxu1 }
 0x155   : > { %v509_v12 = vadd.f32 %v1154_v34, %v486_v4  ;;  %v517_v13 = vadd.f32 %v1154_v34, %v494_v5  ;;  %v487_v14 = vmul.f32 %v715_v10, %v667_v32  ;;  %v495_v15 = vmul.f32 %v723_v11, %v667_v32  ;;  %v429_v16 = vpop.f32.mrb[7].mxu0  ;;  %v461_v17 = vpop.f32.mrb[7].mxu1 }
 0x156   : > { %v507_v18 = vadd.f32 %v1154_v34, %v484_v8  ;;  %v515_v19 = vadd.f32 %v1154_v34, %v492_v9  ;;  %v485_v20 = vmul.f32 %v667_v32, %v429_v16  ;;  %v493_v21 = vmul.f32 %v667_v32, %v461_v17 }
 0x157   : > { %v525_v22 = vmax.f32 %v509_v12, 0.0  ;;  %v533_v23 = vmax.f32 %v517_v13, 0.0  ;;  %v510_v24 = vadd.f32 %v1154_v34, %v487_v14  ;;  %v518_v25 = vadd.f32 %v1154_v34, %v495_v15 }
 0x158   : > { %v523_v26 = vmax.f32 %v507_v18, 0.0  ;;  %v531_v27 = vmax.f32 %v515_v19, 0.0  ;;  %v508_v28 = vadd.f32 %v1154_v34, %v485_v20  ;;  %v516_v29 = vadd.f32 %v1154_v34, %v493_v21 }
 0x159   : > { %541 = vst [vmem:[%s1166_s9 + $0x30] sm:$0xff] %v525_v22  ;;  %549 = vst [vmem:[%s1166_s9 + $0x70] sm:$0xff] %v533_v23  ;;  %v526_v30 = vmax.f32 %v510_v24, 0.0  ;;  %v534_v31 = vmax.f32 %v518_v25, 0.0 }
 0x15a   : > { %539 = vst [vmem:[%s1166_s9 + $0x20] sm:$0xff] %v523_v26  ;;  %547 = vst [vmem:[%s1166_s9 + $0x60] sm:$0xff] %v531_v27  ;;  %v524_v32 = vmax.f32 %v508_v28, 0.0  ;;  %v532_v33 = vmax.f32 %v516_v29, 0.0 }
 0x15b   : > { %542 = vst [vmem:[%s1166_s9 + $0x38] sm:$0xff] %v526_v30  ;;  %550 = vst [vmem:[%s1166_s9 + $0x78] sm:$0xff] %v534_v31 }
 0x15c   : > { %540 = vst [vmem:[%s1166_s9 + $0x28] sm:$0xff] %v524_v32  ;;  %548 = vst [vmem:[%s1166_s9 + $0x68] sm:$0xff] %v532_v33 }
 0x15d   : > { %882 = shalt.err (!%p879_p7)
}
 0x15e   : > { %s883_s20 = scalar_lea.hbm %s1191_s13, 2048  ;;  %s887_s27 = scalar_lea.hbm %s1248_s6, 8192 }
 0x15f   : > { %p884_p9 = scmp.ne.s32.totalorder %s1191_s13, %s883_s20  ;;  %p888_p5 = scmp.lt.u32.totalorder %s1191_s13, %s1248_s6 }
 0x160   : > { %p889_p10 = scmp.lt.u32.totalorder %s887_s27, %s883_s20  ;;  %p891_p1 = scmp.lt.u32.totalorder %s883_s20, %s1191_s13 }
 0x161   : > { %p885_p11 = pnand %p884_p9, %p1068_p12 }
 0x162   : > { %p890_p2 = por %p889_p10, %p888_p5 }
 0x163   : > { %p886_p0 = pneg %p885_p11 }
 0x164   : > { %p892_p4 = por %p891_p1, %p890_p2 }
 0x166   : > { %p893_p6 = pnand %p892_p4, %p886_p0 }
 0x168   : > { %896 = shalt.err (!%p893_p6)
}
 0x169   : > { %s948_s9 = smov 128   ;;  %s949_s16 = smov 8  }
 0x16a   : > { %746 = dma.vmem_to_hbm [thread:$0]  (%p1068_p12), %s1193_s12, 2048, %s1191_s13, %s552_s30, %s948_s9, %s948_s9, %s949_s16  }
 0x16b PF: > { %p763_p8 = scmp.ge.s32.totalorder %s939_s3, 2  ;;  %s580_s23 = sand.u32 1, %s927_s21  }
 0x16c   : > { %p1263_p13 = scmp.ne.s32.totalorder %s1253_s26, 0  ;;  %s581_s11 = scalar_lea.sflag [#allocation4], %s580_s23 }
 0x16e   : > { %p757_p3 = pnand %p763_p8, %p1263_p13 }
 0x170   : > { %922 = dma.done.wait (!%p757_p3), %s581_s11, 2048  }
 0x171   : > { %924 = vsyncadd (!%p757_p3), %s581_s11, 4294965248  ;;  %p20_p7 = scmp.ge.s32.totalorder %s1038_s7, 6   ;;  %s1264_s21 = smov %s931_s2 }
 0x172   : > { %s1265_s2 = smov %s935_s22  ;;  %s1266_s22 = smov %s1064_s28 }
 0x173   : > { %s1267_s3 = smov %s1038_s7  ;;  %22 = sbr.rel (!%p20_p7) target bundleno = 6 (0x6), region = 93 }
 0x17a   :  { %586 = vsyncpa [#allocation3], 1 }
 0x17b   :  { %588 = vsyncpa [#allocation3 + $0x1], 1 }
 0x17c   :  { %589 = vsyncpa [#allocation6], 1 }
 0x17d   :  { %590 = vsyncpa [#allocation4], 1 }
 0x17e   :  { %592 = vsyncpa [#allocation4 + $0x1], 1 }

</bundles_post_ra>
